<compile_context>
chip_gen: v7x
topology: tpu7x:2x2x1
jax: 0.10.0
libtpu: 0.0.40
codegen_flags: <defaults>
</compile_context>

<pallas_src>
import math

import jax
import jax.numpy as jnp
from jax.experimental import pallas as pl
from jax.experimental.pallas import tpu as pltpu


# --------------------------------------------------------------------------
# Fused kernel: one block = (tm, K) activations x (K, N) weight -> (tm, N)
# --------------------------------------------------------------------------
def _qy_kernel(z_ref, w_ref, b_ref, o_ref):
    h = jnp.maximum(z_ref[...], 0.0)                         # ReLU on VPU
    acc = jnp.dot(h, w_ref[...],
                  preferred_element_type=jnp.float32)        # MXU, f32 acc
    o_ref[...] = (acc + b_ref[...]).astype(o_ref.dtype)      # bias epilogue


def _round_up(v, m):
    return (v + m - 1) // m * m


def qy_forward(zy, w_t, b, *, max_block_m=8192):
    """loc_y = relu(zy) @ w_t + b.

    zy:  (M, K) float32 latent activations
    w_t: (K, N) float32 — PyTorch fc1.weight (N, K) pre-transposed ONCE at
         parameter-prep time (hoisted out of the per-step forward).
    b:   (N,)  float32 bias
    """
    M, K = zy.shape
    K2, N = w_t.shape
    assert K == K2 and b.shape == (N,)

    # Tile only the batch axis. K and N stay full-array blocks, so the tiny
    # feature dims (z_dim=16, y_dim=10) are never padded.
    # Cap the tile at half the batch (8-aligned) so v7x gets >= 2 parallel
    # blocks to shard across its 2 TensorCores whenever M is large enough.
    half_m = _round_up(max(-(-M // 2), 1), 8)
    tm = max(8, min(half_m, max_block_m))
    grid_m = pl.cdiv(M, tm)          # ragged last block handled by Pallas

    b2 = b.reshape(1, N)

    cost = pl.CostEstimate(
        flops=2 * M * K * N,
        transcendentals=0,
        bytes_accessed=4 * (M * K + K * N + M * N + N),
    )

    out = pl.pallas_call(
        _qy_kernel,
        out_shape=jax.ShapeDtypeStruct((M, N), jnp.float32),
        grid_spec=pltpu.PrefetchScalarGridSpec(
            num_scalar_prefetch=0,
            grid=(grid_m,),
            in_specs=[
                pl.BlockSpec((tm, K), lambda i: (i, 0)),   # activations tile
                pl.BlockSpec((K, N), lambda i: (0, 0)),    # whole weight
                pl.BlockSpec((1, N), lambda i: (0, 0)),    # bias row
            ],
            out_specs=pl.BlockSpec((tm, N), lambda i: (i, 0)),
        ),
        compiler_params=pltpu.CompilerParams(
            dimension_semantics=("parallel",)),
        cost_estimate=cost,
    )(zy, w_t, b2)
    return out


# --------------------------------------------------------------------------
# Parameter init matching the PyTorch module (xavier_uniform weight, zero bias)
# plus one-time layout prep (pre-transposed weight).
# --------------------------------------------------------------------------
def init_qy_params(key, z_dim, y_dim):
    bound = math.sqrt(6.0 / (z_dim + y_dim))
    w = jax.random.uniform(key, (y_dim, z_dim), jnp.float32, -bound, bound)
    b = jnp.zeros((y_dim,), jnp.float32)
    return {"w_t": jnp.asarray(w.T), "b": b}


if __name__ == "__main__":
    # Module signature: qy(d_dim, x_dim, y_dim, z_dim); forward takes zy (B, z_dim).
    B, d_dim, x_dim, y_dim, z_dim = 2, 5, 784, 10, 16
    key = jax.random.PRNGKey(0)
    pkey, zkey = jax.random.split(key)

    params = init_qy_params(pkey, z_dim, y_dim)
    zy = jax.random.normal(zkey, (B, z_dim), jnp.float32)

    loc_y = qy_forward(zy, params["w_t"], params["b"])
    loc_y = jax.block_until_ready(loc_y)

    # Pure-JAX reference check of the fused kernel.
    ref = jnp.maximum(zy, 0.0) @ params["w_t"] + params["b"]
    assert loc_y.shape == (B, y_dim)
    assert bool(jnp.allclose(loc_y, ref, atol=1e-5, rtol=1e-5))

    # Also exercise a larger batch that spans multiple (ragged) grid blocks.
    zkey2 = jax.random.fold_in(zkey, 1)
    zy_big = jax.random.normal(zkey2, (1000, z_dim), jnp.float32)
    out_big = jax.block_until_ready(
        qy_forward(zy_big, params["w_t"], params["b"]))
    ref_big = jnp.maximum(zy_big, 0.0) @ params["w_t"] + params["b"]
    assert bool(jnp.allclose(out_big, ref_big, atol=1e-5, rtol=1e-5))

    print("KERNEL_OK")
</pallas_src>

<mosaic_0001>
module attributes {stable_mosaic.version = 11 : i64} {
  func.func @_qy_kernel(%arg0: i32, %arg1: memref<8x16xf32, #tpu.memory_space<vmem>>, %arg2: memref<16x10xf32, #tpu.memory_space<vmem>>, %arg3: memref<1x10xf32, #tpu.memory_space<vmem>>, %arg4: memref<8x10xf32, #tpu.memory_space<vmem>>) attributes {dimension_semantics = [#tpu.dimension_semantics<parallel>], iteration_bounds = array<i64: 1>, scalar_prefetch = 0 : i64, scratch_operands = 0 : i64, tpu.core_type = #tpu.core_type<tc>, window_params = [{transform_indices = @transform_0, window_bounds = array<i64: 8, 16>}, {pipeline_mode = #tpu.pipeline_mode<synchronous>, transform_indices = @transform_1, window_bounds = array<i64: 16, 10>}, {pipeline_mode = #tpu.pipeline_mode<synchronous>, transform_indices = @transform_2, window_bounds = array<i64: 1, 10>}, {transform_indices = @transform_3, window_bounds = array<i64: 8, 10>}]} {
    %c0 = arith.constant 0 : index
    %c0_0 = arith.constant 0 : index
    %0 = vector.load %arg1[%c0, %c0_0] : memref<8x16xf32, #tpu.memory_space<vmem>>, vector<8x16xf32>
    %cst = arith.constant 0.000000e+00 : f32
    %1 = vector.broadcast %cst : f32 to vector<8x16xf32>
    %2 = arith.maximumf %0, %1 : vector<8x16xf32>
    %c0_1 = arith.constant 0 : index
    %c0_2 = arith.constant 0 : index
    %3 = vector.load %arg2[%c0_1, %c0_2] : memref<16x10xf32, #tpu.memory_space<vmem>>, vector<16x10xf32>
    %cst_3 = arith.constant dense<0.000000e+00> : vector<8x10xf32>
    %4 = tpu.matmul %2, %3, %cst_3 {dimension_numbers = #tpu.dot_dimension_numbers<[1], [0], [0], [1], [0, 0, 1, 1], [], []>} : vector<8x16xf32>, vector<16x10xf32>, vector<8x10xf32> -> vector<8x10xf32>
    %c0_4 = arith.constant 0 : index
    %c0_5 = arith.constant 0 : index
    %5 = vector.load %arg3[%c0_4, %c0_5] : memref<1x10xf32, #tpu.memory_space<vmem>>, vector<1x10xf32>
    %6 = vector.broadcast %5 : vector<1x10xf32> to vector<8x10xf32>
    %7 = arith.addf %4, %6 : vector<8x10xf32>
    %c0_6 = arith.constant 0 : index
    %c0_7 = arith.constant 0 : index
    %8 = vector.load %arg4[%c0_6, %c0_7] : memref<8x10xf32, #tpu.memory_space<vmem>>, vector<8x10xf32>
    tpu.vector_store %arg4[%c0_6, %c0_7], %7 {strides = array<i32>} : memref<8x10xf32, #tpu.memory_space<vmem>>, vector<8x10xf32>,
    return
  }
  func.func @transform_0(%arg0: i32) -> (i32, i32) {
    %c0_i32 = arith.constant 0 : i32
    %c0_i32_0 = arith.constant 0 : i32
    return %arg0, %c0_i32 : i32, i32
  }
  func.func @transform_1(%arg0: i32) -> (i32, i32) {
    %c0_i32 = arith.constant 0 : i32
    %c0_i32_0 = arith.constant 0 : i32
    %c0_i32_1 = arith.constant 0 : i32
    return %c0_i32, %c0_i32_0 : i32, i32
  }
  func.func @transform_2(%arg0: i32) -> (i32, i32) {
    %c0_i32 = arith.constant 0 : i32
    %c0_i32_0 = arith.constant 0 : i32
    %c0_i32_1 = arith.constant 0 : i32
    return %c0_i32, %c0_i32_0 : i32, i32
  }
  func.func @transform_3(%arg0: i32) -> (i32, i32) {
    %c0_i32 = arith.constant 0 : i32
    %c0_i32_0 = arith.constant 0 : i32
    return %arg0, %c0_i32 : i32, i32
  }
}

</mosaic_0001>

<bundles_post_ra>
// kernel: tpu_custom_call.1
= control target key start
LH: loop header
LB: loop body
LE: loop exit
PB: predicated region body
PF: predicated region fallthrough
CT: control target
= control target key end

     0   :  { %8 = vsyncpa [#allocation3], 0  ;;  %s320_s0 = inlined_call_operand.hbm [shape: f32[2,16], index: 0, kind: input, shape index: {}]   ;;  %s321_s1 = inlined_call_operand.hbm [shape: f32[16,10], index: 1, kind: input, shape index: {}]   ;;  %s322_s2 = inlined_call_operand.vmem [shape: f32[1,10], index: 2, kind: input, shape index: {}]   ;;  %s323_s3 = inlined_call_operand.hbm [shape: f32[2,10], index: 3, kind: output, shape index: {}]  }
   0x1   :  { %9 = vsyncpa [#allocation6], 0 }
   0x2   :  { %10 = vsyncpa [#allocation4], 0 }
   0x3   :  { %15 = vsyncadd [#allocation3], 96  ;;  %s245_s12 = smov [#allocation2]   ;;  %s173_s16 = scalar_lea.hbm %s320_s0, 32 }
   0x4   :  { %s16_s13 = sshll.u32 %s245_s12, 4  ;;  %p174_p0 = scmp.ne.s32.totalorder %s320_s0, %s173_s16  ;;  %s17_s13 = int_to_ptr.vmem [resolvable:$true] %s16_s13 }
   0x5   :  { %p177_p1 = scmp.lt.u32.totalorder %s173_s16, %s320_s0 }
   0x7   :  { %p179_p2 = pnand %p177_p1, %p174_p0 }
   0x9   :  { %182 = shalt.err (!%p179_p2)
}
   0xa   :  { %s183_s21 = scalar_lea.vmem %s17_s13, 32  ;;  %s187_s22 = scalar_lea.vmem %s17_s13, 128 }
   0xb   :  { %p184_p3 = scmp.ne.s32.totalorder %s17_s13, %s183_s21  ;;  %p188_p4 = scmp.lt.s32.totalorder %s17_s13, %s17_s13 }
   0xc   :  { %p189_p5 = scmp.lt.s32.totalorder %s187_s22, %s183_s21 }
   0xe   :  { %p190_p6 = por %p189_p5, %p188_p4 }
  0x10   :  { %p191_p7 = pnand %p190_p6, %p184_p3 }
  0x12   :  { %194 = shalt.err (!%p191_p7)
}
  0x13   :  { %s246_s23 = smov 32   ;;  %s247_s24 = smov 2  }
  0x14   :  { %22 = dma.hbm_to_vmem [thread:$0]  %s320_s0, 32, %s17_s13, [#allocation3], %s246_s23, %s246_s23, %s247_s24  }
  0x15   :  { %s248_s27 = smov [#allocation5]   ;;  %s195_s4 = scalar_lea.hbm %s321_s1, 256 }
  0x16   :  { %s28_s28 = sshll.u32 %s248_s27, 4  ;;  %p196_p8 = scmp.ne.s32.totalorder %s321_s1, %s195_s4  ;;  %s29_s28 = int_to_ptr.vmem [resolvable:$true] %s28_s28 }
  0x17   :  { %p199_p9 = scmp.lt.u32.totalorder %s195_s4, %s321_s1 }
  0x19   :  { %p201_p10 = pnand %p199_p9, %p196_p8 }
  0x1b   :  { %204 = shalt.err (!%p201_p10)
}
  0x1c   :  { %s205_s9 = scalar_lea.vmem %s29_s28, 256  ;;  %p210_p12 = scmp.lt.s32.totalorder %s29_s28, %s29_s28 }
  0x1d   :  { %p206_p11 = scmp.ne.s32.totalorder %s29_s28, %s205_s9  ;;  %p211_p13 = scmp.lt.s32.totalorder %s205_s9, %s205_s9 }
  0x1f   :  { %p212_p0 = por %p211_p13, %p210_p12 }
  0x21   :  { %p213_p1 = pnand %p212_p0, %p206_p11 }
  0x23   :  { %216 = shalt.err (!%p213_p1)
}
  0x24   :  { %s249_s0 = smov 128   ;;  %s250_s10 = smov 8  }
  0x25   :  { %34 = dma.hbm_to_vmem [thread:$0]  %s321_s1, 256, %s29_s28, [#allocation6], %s249_s0, %s249_s0, %s250_s10  }
  0x26   :  { %239 = dma.done.wait [#allocation3], 128  }
  0x27   :  { %240 = vsyncadd [#allocation3], 4294967168 }
  0x28   :  { %241 = dma.done.wait [#allocation6], 256  }
  0x29   :  { %242 = vsyncadd [#allocation6], 4294967040  ;;  %v251_v0 = vmov 0.0|0.0   ;;  %vm252_vm0 = vmmov 0   ;;  %v253_v1 = vmov 0.0   ;;  %v45_v2 = vld [vmem:[#allocation5] sm:$0xff] }
  0x2a   :  { %160 = vmatprep.subr.bf16.mxu0 %v251_v0  ;;  %157 = vmatprep.mubr.msk.f32.mxu0 %vm252_vm0, %v253_v1  ;;  %v46_v3 = vld [vmem:[#allocation5 + $0x8] sm:$0xff]  ;;  %v43_v4 = vld [vmem:[#allocation2] sm:$0xff]  ;;  %vm54_vm1 = vcmask 130048   ;;  %vm128_vm2 = vcmask 80896  }
  0x2b   :  { %v161_v5 = vpack.c.bf16 %v46_v3, %v45_v2  ;;  %v44_v6 = vmax.f32 %v43_v4, 0.0  ;;  %v148_v7 = vld [vmem:[%s322_s2] ss:$0 sm:$0xff] }
  0x2d   :  { %162 = vmatpush3.bf16.msra.mxu0 %v161_v5 }
  0x30   :  { %158 = vmatmul.mubr.msk.f32.vlgmr.msra.gmra.mrb[0].mxu0 %vm54_vm1, %v44_v6 }
 0x103   :  { %v124_v8 = vpop.f32.mrb[0].mxu0 }
 0x104   :  { %v125_v9 = vadd.f32 %v148_v7, %v124_v8  ;;  %v159_v10 = vpop.f32.mrb[1].mxu0 }
 0x106   :  { %129 = vst.msk [vmem:[#allocation7] sm:$0xff] %vm128_vm2, %v125_v9 }
 0x107   :  { %134 = vsyncadd [#allocation4], 96  ;;  %s254_s1 = smov [#allocation7]  }
 0x108   :  { %s135_s15 = sshll.u32 %s254_s1, 4  ;;  %s136_s15 = int_to_ptr.vmem [resolvable:$true] %s135_s15 }
 0x109   :  { %s217_s16 = scalar_lea.vmem %s136_s15, 32  ;;  %s221_s17 = scalar_lea.vmem %s136_s15, 128 }
 0x10a   :  { %p218_p2 = scmp.ne.s32.totalorder %s136_s15, %s217_s16  ;;  %p222_p3 = scmp.lt.s32.totalorder %s136_s15, %s136_s15 }
 0x10b   :  { %p223_p4 = scmp.lt.s32.totalorder %s221_s17, %s217_s16 }
 0x10d   :  { %p224_p5 = por %p223_p4, %p222_p3 }
 0x10f   :  { %p225_p6 = pnand %p224_p5, %p218_p2 }
 0x111   :  { %228 = shalt.err (!%p225_p6)
}
 0x112   :  { %s229_s2 = scalar_lea.hbm %s323_s3, 32 }
 0x113   :  { %p230_p7 = scmp.ne.s32.totalorder %s323_s3, %s229_s2  ;;  %p233_p8 = scmp.lt.u32.totalorder %s229_s2, %s323_s3 }
 0x115   :  { %p235_p9 = pnand %p233_p8, %p230_p7 }
 0x117   :  { %238 = shalt.err (!%p235_p9)
}
 0x118   :  { %141 = dma.vmem_to_hbm [thread:$0]  %s136_s15, 32, %s323_s3, [#allocation4], %s246_s23, %s246_s23, %s247_s24  }
 0x119   :  { %243 = dma.done.wait [#allocation4], 128  }
 0x11a   :  { %244 = vsyncadd [#allocation4], 4294967168 }
 0x11b   :  { %145 = vsyncpa [#allocation3], 1 }
 0x11c   :  { %146 = vsyncpa [#allocation6], 1 }
 0x11d   :  { %147 = vsyncpa [#allocation4], 1 }

</bundles_post_ra>
